<compile_context>
chip_gen: v7x
topology: tpu7x:2x2x1
jax: 0.10.0
libtpu: 0.0.40
codegen_flags: <defaults>
</compile_context>

<pallas_src>
import functools

import jax
import jax.numpy as jnp
from jax import lax
from jax.experimental import pallas as pl
from jax.experimental.pallas import tpu as pltpu


# ----------------------------- Pallas kernel --------------------------------
def _folded_conv_kernel(xb_ref, w_ref, b_ref, o_ref):
    """o = xb @ W + B  (single f32-accumulated MXU matmul, 1024-lane output)."""
    o_ref[...] = (jnp.dot(xb_ref[...], w_ref[...],
                          preferred_element_type=jnp.float32)
                  + b_ref[...]).astype(o_ref.dtype)


def _folded_forward(xb, w, b):
    m, k = xb.shape
    c = w.shape[1]
    return pl.pallas_call(
        _folded_conv_kernel,
        out_shape=jax.ShapeDtypeStruct((m, c), xb.dtype),
        grid=(1,),
        in_specs=[
            pl.BlockSpec((m, k), lambda i: (0, 0)),
            pl.BlockSpec((k, c), lambda i: (0, 0)),
            pl.BlockSpec((1, c), lambda i: (0, 0)),
        ],
        out_specs=pl.BlockSpec((m, c), lambda i: (0, 0)),
        compiler_params=pltpu.CompilerParams(
            dimension_semantics=("arbitrary",)),
    )(xb, w, b)


# --------------------------- one-time parameter prep -------------------------
def prepare_params(params, length):
    """Fold conv1 (+ bridge reshape) and conv2 into a single weight/bias.

    TODO(synk): the original module feeds Conv1d(out=256) output directly into
    Conv2d(in=512) (a PyTorch "jit_fail" case); we bridge with the same
    value-preserving reshape as before (C1out*L == C2in*H*W), i.e. conv2 input
    channel c maps to conv1 output (o, d) = (c // fold, c % fold).
    """
    w1, b1, w2, b2 = params
    c1out, cin = w1.shape
    c2out, c2in = w2.shape
    assert c2in % c1out == 0, "bridge requires C2_in % C1_out == 0"
    fold = c2in // c1out                     # = 2
    assert length % fold == 0, "bridge requires L % (C2_in // C1_out) == 0"
    hw = length // fold                      # spatial size after the bridge

    # w2r[j, o, d] = w2[j, o*fold + d]
    w2r = w2.reshape(c2out, c1out, fold)
    hi = lax.Precision.HIGHEST               # keep the offline fold f32-exact
    # W[d*Cin + k, j] = sum_o w1[o, k] * w2[j, o*fold + d]
    w_fold = jnp.einsum("ok,jod->dkj", w1, w2r,
                        precision=hi).reshape(fold * cin, c2out)
    # B[j] = sum_{o,d} b1[o] * w2[j, o*fold + d] + b2[j]
    b_fold = (jnp.einsum("o,jod->j", b1, w2r, precision=hi) + b2)[None, :]
    return w_fold, b_fold, fold, hw


# ------------------------------ Model forward --------------------------------
@functools.partial(jax.jit, static_argnames=("fold", "hw"))
def model_forward(x, w_fold, b_fold, *, fold, hw):
    n, cin, length = x.shape
    c2out = w_fold.shape[1]
    # Pack input: xb[n*hw + p, d*Cin + k] = x[n, k, d*hw + p]   (~10 KB).
    xb = jnp.transpose(x.reshape(n, cin, fold, hw),
                       (0, 3, 2, 1)).reshape(n * hw, fold * cin)
    y = _folded_forward(xb, w_fold, b_fold)          # (N*HW, C2out) lane-dense
    # NC* permutation + flatten: cheap (~128 KB) XLA transpose in the wrapper.
    return jnp.swapaxes(y.reshape(n, hw, c2out), 1, 2).reshape(n, -1)


if __name__ == "__main__":
    key = jax.random.PRNGKey(0)
    k1, k2, k3, k4, kx = jax.random.split(key, 5)

    # Parameters (deterministic, PyTorch-style uniform(-1/sqrt(fan_in), +...))
    c1_in, c1_out = 10, 256
    c2_in, c2_out = 512, 1024
    bd1 = 1.0 / (c1_in ** 0.5)
    w1 = jax.random.uniform(k1, (c1_out, c1_in), jnp.float32, -bd1, bd1)
    b1 = jax.random.uniform(k2, (c1_out,), jnp.float32, -bd1, bd1)
    bd2 = 1.0 / (c2_in ** 0.5)
    w2 = jax.random.uniform(k3, (c2_out, c2_in), jnp.float32, -bd2, bd2)
    b2 = jax.random.uniform(k4, (c2_out,), jnp.float32, -bd2, bd2)
    params = (w1, b1, w2, b2)

    # Input for Conv1d(10, 256): (batch=2, channels=10, length=32)
    N, L = 2, 32
    x = jax.random.normal(kx, (N, c1_in, L), jnp.float32)

    # One-time parameter prep (off the per-call critical path).
    w_fold, b_fold, fold, hw = prepare_params(params, L)
    w_fold, b_fold = jax.block_until_ready((w_fold, b_fold))

    out = jax.block_until_ready(
        model_forward(x, w_fold, b_fold, fold=fold, hw=hw))
    HW = (c1_out * L) // c2_in
    assert out.shape == (N, c2_out * HW), out.shape

    # Pure-JAX reference of the same (bridged) forward pass.
    hi = lax.Precision.HIGHEST
    r1 = jnp.einsum("ncl,oc->nol", x, w1, precision=hi) + b1[None, :, None]
    r1 = r1.reshape(N, c2_in, HW)
    r2 = jnp.einsum("ncp,oc->nop", r1, w2, precision=hi) + b2[None, :, None]
    ref = r2.reshape(N, -1)
    assert jnp.allclose(out, ref, atol=1e-4, rtol=5e-4), \
        float(jnp.max(jnp.abs(out - ref)))

    print("KERNEL_OK")
</pallas_src>

<mosaic_0001>
module attributes {stable_mosaic.version = 11 : i64} {
  func.func @_folded_conv_kernel(%arg0: i32, %arg1: memref<32x20xf32, #tpu.memory_space<vmem>>, %arg2: memref<20x1024xf32, #tpu.memory_space<vmem>>, %arg3: memref<1x1024xf32, #tpu.memory_space<vmem>>, %arg4: memref<32x1024xf32, #tpu.memory_space<vmem>>) attributes {dimension_semantics = [#tpu.dimension_semantics<arbitrary>], iteration_bounds = array<i64: 1>, scalar_prefetch = 0 : i64, scratch_operands = 0 : i64, tpu.core_type = #tpu.core_type<tc>, window_params = [{pipeline_mode = #tpu.pipeline_mode<synchronous>, transform_indices = @transform_0, window_bounds = array<i64: 32, 20>}, {pipeline_mode = #tpu.pipeline_mode<synchronous>, transform_indices = @transform_1, window_bounds = array<i64: 20, 1024>}, {pipeline_mode = #tpu.pipeline_mode<synchronous>, transform_indices = @transform_2, window_bounds = array<i64: 1, 1024>}, {pipeline_mode = #tpu.pipeline_mode<synchronous>, transform_indices = @transform_3, window_bounds = array<i64: 32, 1024>}]} {
    %c0 = arith.constant 0 : index
    %c0_0 = arith.constant 0 : index
    %0 = vector.load %arg1[%c0, %c0_0] : memref<32x20xf32, #tpu.memory_space<vmem>>, vector<32x20xf32>
    %c0_1 = arith.constant 0 : index
    %c0_2 = arith.constant 0 : index
    %1 = vector.load %arg2[%c0_1, %c0_2] : memref<20x1024xf32, #tpu.memory_space<vmem>>, vector<20x1024xf32>
    %cst = arith.constant dense<0.000000e+00> : vector<32x1024xf32>
    %2 = tpu.matmul %0, %1, %cst {dimension_numbers = #tpu.dot_dimension_numbers<[1], [0], [0], [1], [0, 0, 1, 1], [], []>} : vector<32x20xf32>, vector<20x1024xf32>, vector<32x1024xf32> -> vector<32x1024xf32>
    %c0_3 = arith.constant 0 : index
    %c0_4 = arith.constant 0 : index
    %3 = vector.load %arg3[%c0_3, %c0_4] : memref<1x1024xf32, #tpu.memory_space<vmem>>, vector<1x1024xf32>
    %4 = vector.broadcast %3 : vector<1x1024xf32> to vector<32x1024xf32>
    %5 = arith.addf %2, %4 : vector<32x1024xf32>
    %c0_5 = arith.constant 0 : index
    %c0_6 = arith.constant 0 : index
    %6 = vector.load %arg4[%c0_5, %c0_6] : memref<32x1024xf32, #tpu.memory_space<vmem>>, vector<32x1024xf32>
    tpu.vector_store %arg4[%c0_5, %c0_6], %5 {strides = array<i32>} : memref<32x1024xf32, #tpu.memory_space<vmem>>, vector<32x1024xf32>,
    return
  }
  func.func @transform_0(%arg0: i32) -> (i32, i32) {
    %c0_i32 = arith.constant 0 : i32
    %c0_i32_0 = arith.constant 0 : i32
    %c0_i32_1 = arith.constant 0 : i32
    return %c0_i32, %c0_i32_0 : i32, i32
  }
  func.func @transform_1(%arg0: i32) -> (i32, i32) {
    %c0_i32 = arith.constant 0 : i32
    %c0_i32_0 = arith.constant 0 : i32
    %c0_i32_1 = arith.constant 0 : i32
    return %c0_i32, %c0_i32_0 : i32, i32
  }
  func.func @transform_2(%arg0: i32) -> (i32, i32) {
    %c0_i32 = arith.constant 0 : i32
    %c0_i32_0 = arith.constant 0 : i32
    %c0_i32_1 = arith.constant 0 : i32
    return %c0_i32, %c0_i32_0 : i32, i32
  }
  func.func @transform_3(%arg0: i32) -> (i32, i32) {
    %c0_i32 = arith.constant 0 : i32
    %c0_i32_0 = arith.constant 0 : i32
    %c0_i32_1 = arith.constant 0 : i32
    return %c0_i32, %c0_i32_0 : i32, i32
  }
}

</mosaic_0001>

<bundles_post_ra>
// kernel: model_forward.1
= control target key start
LH: loop header
LB: loop body
LE: loop exit
PB: predicated region body
PF: predicated region fallthrough
CT: control target
= control target key end

     0   :  { %v555_v3 = vmov 0.0   ;;  %vm97_vm0 = vcmask 1043456   ;;  %vm84_vm1 = vcmask 162816   ;;  %v44_v37 = vlaneseq  ;;  %s809_s1 = inlined_call_operand.vmem [shape: f32[20,1024], index: 1, kind: input, shape index: {}]   ;;  %s810_s0 = inlined_call_operand.vmem [shape: f32[32,20], index: 0, kind: input, shape index: {}]   ;;  %s811_s2 = inlined_call_operand.vmem [shape: f32[1,1024], index: 2, kind: input, shape index: {}]   ;;  %s812_s3 = inlined_call_operand.vmem [shape: f32[32,1024], index: 3, kind: output, shape index: {}]  }
   0x1   :  { %v19_v0 = vld [vmem:[%s809_s1 + $0x8] sm:$0xff]  ;;  %v21_v2 = vld [vmem:[%s809_s1 + $0x18] sm:$0xff]  ;;  %186 = vmatprep.mubr.f32.mxu0 %v555_v3  ;;  %275 = vmatprep.mubr.f32.mxu1 %v555_v3  ;;  %v18_v6 = vld [vmem:[%s809_s1] sm:$0xff] }
   0x2   :  { %v27_v1 = vld [vmem:[%s809_s1 + $0x48] sm:$0xff]  ;;  %v29_v5 = vld [vmem:[%s809_s1 + $0x58] sm:$0xff]  ;;  %v26_v7 = vld [vmem:[%s809_s1 + $0x40] sm:$0xff]  ;;  %v700_v38 = vshrl.u32 %v44_v37, 7 }
   0x3   :  { %v538_v4 = vpack.c.bf16 %v27_v1, %v19_v0  ;;  %v542_v8 = vpack.c.bf16 %v29_v5, %v21_v2  ;;  %v540_v9 = vpack.c.bf16 %v26_v7, %v18_v6  ;;  %v20_v10 = vld [vmem:[%s809_s1 + $0x10] sm:$0xff]  ;;  %v35_v12 = vld [vmem:[%s809_s1 + $0x88] sm:$0xf]  ;;  %v37_v14 = vld [vmem:[%s809_s1 + $0x98] sm:$0xf] }
   0x4   :  { %v28_v11 = vld [vmem:[%s809_s1 + $0x50] sm:$0xff]  ;;  %v34_v15 = vld [vmem:[%s809_s1 + $0x80] sm:$0xf]  ;;  %v23_v18 = vld [vmem:[%s809_s1 + $0x28] sm:$0xff]  ;;  %v46_v39 = vsub.s32 0, %v700_v38  ;;  %v54_v41 = vsub.s32 2, %v700_v38 }
   0x5   :  { %539 = vmatprep.subr.bf16.mxu0 %v538_v4  ;;  %v544_v13 = vpack.c.bf16 %v28_v11, %v20_v10  ;;  %543 = vmatprep.subr.bf16.mxu1 %v542_v8  ;;  %v36_v16 = vld [vmem:[%s809_s1 + $0x90] sm:$0xf]  ;;  %v14_v17 = vld [vmem:[%s810_s0] sm:$0xff]  ;;  %v31_v19 = vld [vmem:[%s809_s1 + $0x68] sm:$0xff]  ;;  %v50_v42 = vsub.s32 1, %v700_v38  ;;  %v58_v43 = vsub.s32 3, %v700_v38 }
   0x6   :  { %541 = vmatpush1.bf16.msra.mxu0 %v540_v9  ;;  %v25_v20 = vld [vmem:[%s809_s1 + $0x38] sm:$0xff]  ;;  %v22_v22 = vld [vmem:[%s809_s1 + $0x20] sm:$0xff]  ;;  %v546_v23 = vpack.c.bf16 %v31_v19, %v23_v18  ;;  %v24_v25 = vld [vmem:[%s809_s1 + $0x30] sm:$0xff]  ;;  %v62_v4 = vsub.s32 4, %v700_v38  ;;  %v70_v8 = vsub.s32 6, %v700_v38  ;;  %v66_v9 = vsub.s32 5, %v700_v38 }
   0x7   :  { %545 = vmatpush1.bf16.msra.mxu1 %v544_v13  ;;  %514 = vmatprep.subr.msk.mxu0 %vm97_vm0, %v35_v12  ;;  %v33_v21 = vld [vmem:[%s809_s1 + $0x78] sm:$0xff]  ;;  %v30_v24 = vld [vmem:[%s809_s1 + $0x60] sm:$0xff]  ;;  %v32_v26 = vld [vmem:[%s809_s1 + $0x70] sm:$0xff]  ;;  %v74_v11 = vsub.s32 7, %v700_v38 }
   0x8   :  { %520 = vmatprep.subr.msk.mxu1 %vm97_vm0, %v37_v14  ;;  %v550_v27 = vpack.c.bf16 %v33_v21, %v25_v20  ;;  %v548_v28 = vpack.c.bf16 %v30_v24, %v22_v22  ;;  %v552_v29 = vpack.c.bf16 %v32_v26, %v24_v25  ;;  %v15_v30 = vld [vmem:[%s810_s0 + $0x8] sm:$0xff]  ;;  %v41_v32 = vld [vmem:[%s809_s1 + $0xb8] sm:$0xf]  ;;  %v38_v33 = vld [vmem:[%s809_s1 + $0xa0] sm:$0xf] }
   0x9   :  { %v39_v31 = vld [vmem:[%s809_s1 + $0xa8] sm:$0xf]  ;;  %v16_v34 = vld [vmem:[%s810_s0 + $0x10] sm:$0xff]  ;;  %v17_v36 = vld [vmem:[%s810_s0 + $0x18] sm:$0xff] }
   0xa   :  { %515 = vmatpush1.msk.msra.mxu0 %vm97_vm0, %v34_v15  ;;  %v40_v35 = vld [vmem:[%s809_s1 + $0xb0] sm:$0xf]  ;;  %v42_v40 = vld [vmem:[%s811_s2] sm:$0xff] }
   0xb   :  { %521 = vmatpush1.msk.msra.mxu1 %vm97_vm0, %v36_v16  ;;  %516 = vmatmul.mubr.msk.f32.vlgmr.msra.gmra.mrb[0].mxu0 %vm84_vm1, %v14_v17  ;;  %v47_v44 = vrot.slane %v42_v40, %v46_v39  ;;  %v55_v45 = vrot.slane %v42_v40, %v54_v41  ;;  %v51_v46 = vrot.slane %v42_v40, %v50_v42 }
   0xc   :  { %522 = vmatmul.mubr.msk.f32.vlgmr.msra.gmra.mrb[0].mxu1 %vm84_vm1, %v14_v17  ;;  %547 = vmatprep.subr.bf16.mxu0 %v546_v23  ;;  %v59_v47 = vrot.slane %v42_v40, %v58_v43  ;;  %v63_v16 = vrot.slane %v42_v40, %v62_v4  ;;  %v71_v20 = vrot.slane %v42_v40, %v70_v8 }
   0xd   :  { %551 = vmatprep.subr.bf16.mxu1 %v550_v27  ;;  %549 = vmatpush1.bf16.msra.mxu0 %v548_v28  ;;  %v67_v21 = vrot.slane %v42_v40, %v66_v9  ;;  %v75_v23 = vrot.slane %v42_v40, %v74_v11 }
   0xe   :  { %553 = vmatpush1.bf16.msra.mxu1 %v552_v29  ;;  %192 = vmatprep.mubr.f32.mxu0 %v555_v3 }
   0xf   :  { %281 = vmatprep.mubr.f32.mxu1 %v555_v3  ;;  %517 = vmatmul.mubr.msk.f32.gmra.mrb[2].mxu0 %vm84_vm1, %v15_v30 }
  0x10   :  { %523 = vmatmul.mubr.msk.f32.gmra.mrb[2].mxu1 %vm84_vm1, %v15_v30  ;;  %198 = vmatprep.mubr.f32.mxu0 %v555_v3 }
  0x11   :  { %287 = vmatprep.mubr.f32.mxu1 %v555_v3  ;;  %526 = vmatprep.subr.msk.mxu0 %vm97_vm0, %v39_v31 }
  0x12   :  { %532 = vmatprep.subr.msk.mxu1 %vm97_vm0, %v41_v32  ;;  %527 = vmatpush1.msk.msra.mxu0 %vm97_vm0, %v38_v33 }
  0x13   :  { %518 = vmatmul.mubr.msk.f32.gmra.mrb[4].mxu0 %vm84_vm1, %v16_v34  ;;  %533 = vmatpush1.msk.msra.mxu1 %vm97_vm0, %v40_v35 }
  0x14   :  { %524 = vmatmul.mubr.msk.f32.gmra.mrb[4].mxu1 %vm84_vm1, %v16_v34  ;;  %204 = vmatprep.mubr.f32.mxu0 %v555_v3 }
  0x15   :  { %293 = vmatprep.mubr.f32.mxu1 %v555_v3 }
  0x17   :  { %519 = vmatmul.mubr.msk.f32.gmra.mrb[6].mxu0 %vm84_vm1, %v17_v36 }
  0x18   :  { %525 = vmatmul.mubr.msk.f32.gmra.mrb[6].mxu1 %vm84_vm1, %v17_v36  ;;  %364 = vmatprep.mubr.f32.mxu0 %v555_v3 }
  0x19   :  { %453 = vmatprep.mubr.f32.mxu1 %v555_v3 }
  0x1b   :  { %528 = vmatmul.mubr.msk.f32.vlgmr.msra.gmra.mrb[8].mxu0 %vm84_vm1, %v14_v17 }
  0x1c   :  { %534 = vmatmul.mubr.msk.f32.vlgmr.msra.gmra.mrb[8].mxu1 %vm84_vm1, %v14_v17  ;;  %370 = vmatprep.mubr.f32.mxu0 %v555_v3 }
  0x1d   :  { %459 = vmatprep.mubr.f32.mxu1 %v555_v3 }
  0x1f   :  { %529 = vmatmul.mubr.msk.f32.gmra.mrb[10].mxu0 %vm84_vm1, %v15_v30 }
  0x20   :  { %535 = vmatmul.mubr.msk.f32.gmra.mrb[10].mxu1 %vm84_vm1, %v15_v30  ;;  %376 = vmatprep.mubr.f32.mxu0 %v555_v3 }
  0x21   :  { %465 = vmatprep.mubr.f32.mxu1 %v555_v3 }
  0x23   :  { %530 = vmatmul.mubr.msk.f32.gmra.mrb[12].mxu0 %vm84_vm1, %v16_v34 }
  0x24   :  { %536 = vmatmul.mubr.msk.f32.gmra.mrb[12].mxu1 %vm84_vm1, %v16_v34  ;;  %382 = vmatprep.mubr.f32.mxu0 %v555_v3 }
  0x25   :  { %471 = vmatprep.mubr.f32.mxu1 %v555_v3 }
  0x27   :  { %531 = vmatmul.mubr.msk.f32.gmra.mrb[14].mxu0 %vm84_vm1, %v17_v36 }
  0x28   :  { %537 = vmatmul.mubr.msk.f32.gmra.mrb[14].mxu1 %vm84_vm1, %v17_v36 }
  0xde   :  { %v188_v48 = vpop.f32.mrb[0].mxu0 }
  0xdf   :  { %v189_v49 = vadd.f32 %v188_v48, %v47_v44  ;;  %v277_v50 = vpop.f32.mrb[0].mxu1  ;;  %v190_v51 = vpop.f32.mrb[1].mxu0 }
  0xe0   :  { %v278_v52 = vadd.f32 %v277_v50, %v55_v45  ;;  %v191_v53 = vadd.f32 %v190_v51, %v51_v46  ;;  %v279_v54 = vpop.f32.mrb[1].mxu1 }
  0xe1   :  { %478 = vst [vmem:[%s812_s3] sm:$0xff] %v189_v49  ;;  %v280_v55 = vadd.f32 %v279_v54, %v59_v47 }
  0xe2   :  { %480 = vst [vmem:[%s812_s3 + $0x10] sm:$0xff] %v278_v52  ;;  %479 = vst [vmem:[%s812_s3 + $0x8] sm:$0xff] %v191_v53  ;;  %v194_v56 = vpop.f32.mrb[2].mxu0 }
  0xe3   :  { %481 = vst [vmem:[%s812_s3 + $0x18] sm:$0xff] %v280_v55  ;;  %v195_v57 = vadd.f32 %v194_v56, %v47_v44  ;;  %v283_v58 = vpop.f32.mrb[2].mxu1  ;;  %v196_v59 = vpop.f32.mrb[3].mxu0 }
  0xe4   :  { %v284_v60 = vadd.f32 %v283_v58, %v55_v45  ;;  %v197_v61 = vadd.f32 %v196_v59, %v51_v46  ;;  %v285_v62 = vpop.f32.mrb[3].mxu1 }
  0xe5   :  { %486 = vst [vmem:[%s812_s3 + $0x40] sm:$0xff] %v195_v57  ;;  %v286_v63 = vadd.f32 %v285_v62, %v59_v47 }
  0xe6   :  { %488 = vst [vmem:[%s812_s3 + $0x50] sm:$0xff] %v284_v60  ;;  %487 = vst [vmem:[%s812_s3 + $0x48] sm:$0xff] %v197_v61  ;;  %v200_v0 = vpop.f32.mrb[4].mxu0 }
  0xe7   :  { %489 = vst [vmem:[%s812_s3 + $0x58] sm:$0xff] %v286_v63  ;;  %v201_v1 = vadd.f32 %v200_v0, %v47_v44  ;;  %v289_v2 = vpop.f32.mrb[4].mxu1  ;;  %v202_v3 = vpop.f32.mrb[5].mxu0 }
  0xe8   :  { %v290_v5 = vadd.f32 %v289_v2, %v55_v45  ;;  %v203_v6 = vadd.f32 %v202_v3, %v51_v46  ;;  %v291_v7 = vpop.f32.mrb[5].mxu1 }
  0xe9   :  { %494 = vst [vmem:[%s812_s3 + $0x80] sm:$0xff] %v201_v1  ;;  %v292_v10 = vadd.f32 %v291_v7, %v59_v47 }
  0xea   :  { %496 = vst [vmem:[%s812_s3 + $0x90] sm:$0xff] %v290_v5  ;;  %495 = vst [vmem:[%s812_s3 + $0x88] sm:$0xff] %v203_v6  ;;  %v206_v12 = vpop.f32.mrb[6].mxu0 }
  0xeb   :  { %497 = vst [vmem:[%s812_s3 + $0x98] sm:$0xff] %v292_v10  ;;  %v207_v13 = vadd.f32 %v206_v12, %v47_v44  ;;  %v295_v14 = vpop.f32.mrb[6].mxu1  ;;  %v208_v15 = vpop.f32.mrb[7].mxu0 }
  0xec   :  { %v296_v17 = vadd.f32 %v295_v14, %v55_v45  ;;  %v209_v18 = vadd.f32 %v208_v15, %v51_v46  ;;  %v297_v19 = vpop.f32.mrb[7].mxu1 }
  0xed   :  { %502 = vst [vmem:[%s812_s3 + $0xc0] sm:$0xff] %v207_v13  ;;  %v298_v22 = vadd.f32 %v297_v19, %v59_v47 }
  0xee   :  { %504 = vst [vmem:[%s812_s3 + $0xd0] sm:$0xff] %v296_v17  ;;  %503 = vst [vmem:[%s812_s3 + $0xc8] sm:$0xff] %v209_v18  ;;  %v366_v24 = vpop.f32.mrb[8].mxu0 }
  0xef   :  { %505 = vst [vmem:[%s812_s3 + $0xd8] sm:$0xff] %v298_v22  ;;  %v367_v25 = vadd.f32 %v366_v24, %v63_v16  ;;  %v455_v26 = vpop.f32.mrb[8].mxu1  ;;  %v368_v27 = vpop.f32.mrb[9].mxu0 }
  0xf0   :  { %v456_v28 = vadd.f32 %v455_v26, %v71_v20  ;;  %v369_v29 = vadd.f32 %v368_v27, %v67_v21  ;;  %v457_v30 = vpop.f32.mrb[9].mxu1 }
  0xf1   :  { %482 = vst [vmem:[%s812_s3 + $0x20] sm:$0xff] %v367_v25  ;;  %v458_v31 = vadd.f32 %v457_v30, %v75_v23 }
  0xf2   :  { %484 = vst [vmem:[%s812_s3 + $0x30] sm:$0xff] %v456_v28  ;;  %483 = vst [vmem:[%s812_s3 + $0x28] sm:$0xff] %v369_v29  ;;  %v372_v32 = vpop.f32.mrb[10].mxu0 }
  0xf3   :  { %485 = vst [vmem:[%s812_s3 + $0x38] sm:$0xff] %v458_v31  ;;  %v373_v33 = vadd.f32 %v372_v32, %v63_v16  ;;  %v461_v34 = vpop.f32.mrb[10].mxu1  ;;  %v374_v35 = vpop.f32.mrb[11].mxu0 }
  0xf4   :  { %v462_v36 = vadd.f32 %v461_v34, %v71_v20  ;;  %v375_v37 = vadd.f32 %v374_v35, %v67_v21  ;;  %v463_v38 = vpop.f32.mrb[11].mxu1 }
  0xf5   :  { %490 = vst [vmem:[%s812_s3 + $0x60] sm:$0xff] %v373_v33  ;;  %v464_v39 = vadd.f32 %v463_v38, %v75_v23 }
  0xf6   :  { %492 = vst [vmem:[%s812_s3 + $0x70] sm:$0xff] %v462_v36  ;;  %491 = vst [vmem:[%s812_s3 + $0x68] sm:$0xff] %v375_v37  ;;  %v378_v40 = vpop.f32.mrb[12].mxu0 }
  0xf7   :  { %493 = vst [vmem:[%s812_s3 + $0x78] sm:$0xff] %v464_v39  ;;  %v379_v41 = vadd.f32 %v378_v40, %v63_v16  ;;  %v467_v42 = vpop.f32.mrb[12].mxu1  ;;  %v380_v43 = vpop.f32.mrb[13].mxu0 }
  0xf8   :  { %v468_v44 = vadd.f32 %v467_v42, %v71_v20  ;;  %v381_v45 = vadd.f32 %v380_v43, %v67_v21  ;;  %v469_v46 = vpop.f32.mrb[13].mxu1 }
  0xf9   :  { %498 = vst [vmem:[%s812_s3 + $0xa0] sm:$0xff] %v379_v41  ;;  %v470_v47 = vadd.f32 %v469_v46, %v75_v23 }
  0xfa   :  { %500 = vst [vmem:[%s812_s3 + $0xb0] sm:$0xff] %v468_v44  ;;  %499 = vst [vmem:[%s812_s3 + $0xa8] sm:$0xff] %v381_v45  ;;  %v384_v48 = vpop.f32.mrb[14].mxu0 }
  0xfb   :  { %501 = vst [vmem:[%s812_s3 + $0xb8] sm:$0xff] %v470_v47  ;;  %v385_v49 = vadd.f32 %v384_v48, %v63_v16  ;;  %v473_v50 = vpop.f32.mrb[14].mxu1  ;;  %v386_v51 = vpop.f32.mrb[15].mxu0 }
  0xfc   :  { %v474_v52 = vadd.f32 %v473_v50, %v71_v20  ;;  %v387_v53 = vadd.f32 %v386_v51, %v67_v21  ;;  %v475_v54 = vpop.f32.mrb[15].mxu1 }
  0xfd   :  { %506 = vst [vmem:[%s812_s3 + $0xe0] sm:$0xff] %v385_v49  ;;  %v476_v55 = vadd.f32 %v475_v54, %v75_v23 }
  0xfe   :  { %508 = vst [vmem:[%s812_s3 + $0xf0] sm:$0xff] %v474_v52  ;;  %507 = vst [vmem:[%s812_s3 + $0xe8] sm:$0xff] %v387_v53 }
  0xff   :  { %509 = vst [vmem:[%s812_s3 + $0xf8] sm:$0xff] %v476_v55 }

</bundles_post_ra>
